<compile_context>
chip_gen: v7x
topology: tpu7x:2x2x1
jax: 0.10.0
libtpu: 0.0.40
codegen_flags: <defaults>
</compile_context>

<pallas_src>
import jax
import jax.numpy as jnp
from jax.experimental import pallas as pl
from jax.experimental.pallas import tpu as pltpu

LANE = 128          # TPU lane width (hidden-dim padding target)
SUBLANE = 8         # sublane granularity for the batch tile
TB_MAX = 8192       # max batch-tile rows
VMEM_BUDGET = 32 << 20   # target working-set bytes for tile selection
VMEM_LIMIT = 48 << 20    # scoped VMEM limit (safe on v5e/v6e/v7x physical caps)


def _round_up(n, m):
    return ((n + m - 1) // m) * m


# ----------------------------------------------------------------------------
# Kernel: one batch tile of the fused 2-matmul MLP.
# ----------------------------------------------------------------------------
def mlp_kernel(x_ref, w1_ref, b1_ref, w23_ref, b23_ref, out_ref):
    # fc1 + ReLU (hidden dim zero-padded to 128 lanes; padded cols stay 0).
    h1 = jnp.dot(x_ref[...], w1_ref[...], preferred_element_type=jnp.float32)
    h1 = jnp.maximum(h1 + b1_ref[...], 0.0)
    # Fused fc2+fc3 — exact linear-algebra identity (no nonlinearity between).
    y = jnp.dot(h1, w23_ref[...], preferred_element_type=jnp.float32) + b23_ref[...]
    out_ref[...] = y.astype(out_ref.dtype)


# ----------------------------------------------------------------------------
# One-time parameter preparation (hoisted out of the per-call path).
# ----------------------------------------------------------------------------
def prepare_params(params):
    """Transpose to (in,out), fuse fc2+fc3, pad ONLY the hidden dim to 128."""
    w1, b1 = params["w1"], params["b1"]          # (h1, in), (h1,)
    w2, b2 = params["w2"], params["b2"]          # (h2, h1), (h2,)
    w3, b3 = params["w3"], params["b3"]          # (out, h2), (out,)

    input_n = w1.shape[1]
    hidden1_n = w1.shape[0]
    output_n = w3.shape[0]

    h1_pad = _round_up(hidden1_n, LANE)

    # fc1 as (in, h1_pad); zero-padded columns give relu(0 + 0) = 0.
    w1_t = jnp.zeros((input_n, h1_pad), jnp.float32).at[:, :hidden1_n].set(
        w1.T.astype(jnp.float32))
    b1_p = jnp.zeros((1, h1_pad), jnp.float32).at[0, :hidden1_n].set(
        b1.astype(jnp.float32))

    # Algebraic fusion of fc2 and fc3 (computed in f32).
    w23 = w2.T.astype(jnp.float32) @ w3.T.astype(jnp.float32)       # (h1, out)
    b23 = b2.astype(jnp.float32) @ w3.T.astype(jnp.float32) + b3.astype(jnp.float32)
    # Pad only the hidden (contraction) dim; output dim stays at its true size
    # so the kernel's HBM writeback is exactly output_n columns wide.
    w23_p = jnp.zeros((h1_pad, output_n), jnp.float32).at[:hidden1_n, :].set(w23)
    b23_p = b23.reshape(1, output_n)

    return {
        "w1": w1_t, "b1": b1_p, "w23": w23_p, "b23": b23_p,
        "input_n": input_n, "output_n": output_n,
    }


# ----------------------------------------------------------------------------
# Batch-tile selection: big enough to amortize per-step overhead, small enough
# to fit the VMEM budget, and (when possible) >=2 grid steps for megacore.
# ----------------------------------------------------------------------------
def _pick_batch_tile(batch, in_n, h1_pad, out_n):
    # Per-row VMEM bytes: double-buffered x + double-buffered out + f32 h1 temp.
    per_row = 4 * (2 * in_n + 2 * out_n + h1_pad)
    tb = min(TB_MAX, max(SUBLANE, VMEM_BUDGET // max(per_row, 1)))
    tb = max(SUBLANE, (tb // SUBLANE) * SUBLANE)
    # Keep >=2 grid steps when the batch is big enough (v7x: 2 TensorCores).
    if batch > 2 * SUBLANE:
        tb = min(tb, _round_up((batch + 1) // 2, SUBLANE))
    # Never bigger than the (sublane-rounded) batch itself.
    tb = min(tb, _round_up(batch, SUBLANE))
    return max(tb, SUBLANE)


# ----------------------------------------------------------------------------
# Forward wrapper: grid over batch, weights resident, minimal-width output.
# ----------------------------------------------------------------------------
def net_forward(x, prep):
    w1, b1, w23, b23 = prep["w1"], prep["b1"], prep["w23"], prep["b23"]
    output_n = prep["output_n"]

    batch, input_n = x.shape
    assert input_n == prep["input_n"], "input feature mismatch"
    in_n = w1.shape[0]          # input width (last dim of x = full dim, OK)
    h1_pad = w1.shape[1]        # 128-padded hidden1

    tb = _pick_batch_tile(batch, in_n, h1_pad, output_n)
    grid = (pl.cdiv(batch, tb),)   # ragged last block handled by Pallas

    itemsize = jnp.dtype(x.dtype).itemsize
    cost = pl.CostEstimate(
        flops=2 * batch * (in_n * h1_pad + h1_pad * output_n),
        transcendentals=0,
        bytes_accessed=batch * (in_n * itemsize + output_n * 4)
        + (in_n * h1_pad + h1_pad * output_n + h1_pad + output_n) * 4,
    )

    out = pl.pallas_call(
        mlp_kernel,
        out_shape=jax.ShapeDtypeStruct((batch, output_n), jnp.float32),
        grid=grid,
        in_specs=[
            pl.BlockSpec((tb, in_n), lambda i: (i, 0)),          # activation stream
            pl.BlockSpec((in_n, h1_pad), lambda i: (0, 0)),      # resident weights
            pl.BlockSpec((1, h1_pad), lambda i: (0, 0)),
            pl.BlockSpec((h1_pad, output_n), lambda i: (0, 0)),
            pl.BlockSpec((1, output_n), lambda i: (0, 0)),
        ],
        out_specs=pl.BlockSpec((tb, output_n), lambda i: (i, 0)),
        compiler_params=pltpu.CompilerParams(
            dimension_semantics=("parallel",),     # megacore sharding on v7x
            vmem_limit_bytes=VMEM_LIMIT,           # above v5e's 16 MiB default
        ),
        cost_estimate=cost,
    )(x, w1, b1, w23, b23)

    return out


# ----------------------------------------------------------------------------
# Init / reference (PyTorch-style params, (out, in) weights).
# ----------------------------------------------------------------------------
def init_params(key, input_n, hidden1_n, hidden2_n, output_n, dtype=jnp.float32):
    """Mimics PyTorch nn.Linear default init (uniform +-1/sqrt(fan_in))."""
    def linear(k, fan_in, fan_out):
        kw, kb = jax.random.split(k)
        bound = 1.0 / jnp.sqrt(fan_in)
        w = jax.random.uniform(kw, (fan_out, fan_in), dtype, -bound, bound)
        b = jax.random.uniform(kb, (fan_out,), dtype, -bound, bound)
        return w, b

    k1, k2, k3 = jax.random.split(key, 3)
    w1, b1 = linear(k1, input_n, hidden1_n)
    w2, b2 = linear(k2, hidden1_n, hidden2_n)
    w3, b3 = linear(k3, hidden2_n, output_n)
    return {"w1": w1, "b1": b1, "w2": w2, "b2": b2, "w3": w3, "b3": b3}


def net_forward_ref(x, p):
    """Pure-JAX reference matching the PyTorch forward exactly."""
    h1 = jnp.maximum(x @ p["w1"].T + p["b1"], 0.0)
    h2 = h1 @ p["w2"].T + p["b2"]
    return h2 @ p["w3"].T + p["b3"]


if __name__ == "__main__":
    # Small shapes consistent with Net(input_n, hidden1_n, hidden2_n, output_n)
    batch, input_n, hidden1_n, hidden2_n, output_n = 8, 32, 64, 32, 16

    key = jax.random.PRNGKey(0)
    kx, kp = jax.random.split(key)

    x = jax.random.normal(kx, (batch, input_n), dtype=jnp.float32)
    params = init_params(kp, input_n, hidden1_n, hidden2_n, output_n)

    # One-time prep (transpose + fc2/fc3 fusion + 128-lane hidden padding).
    prep = prepare_params(params)

    out = net_forward(x, prep)
    out = jax.block_until_ready(out)

    ref = net_forward_ref(x, params)
    assert out.shape == (batch, output_n)
    # Fusion reorders f32 accumulation slightly -> modest tolerance.
    assert jnp.allclose(out, ref, atol=1e-4, rtol=1e-4), "Pallas output mismatch vs reference"

    print("KERNEL_OK")
</pallas_src>

<mosaic_0001>
module attributes {stable_mosaic.version = 11 : i64} {
  func.func @mlp_kernel(%arg0: i32, %arg1: memref<8x32xf32, #tpu.memory_space<vmem>>, %arg2: memref<32x128xf32, #tpu.memory_space<vmem>>, %arg3: memref<1x128xf32, #tpu.memory_space<vmem>>, %arg4: memref<128x16xf32, #tpu.memory_space<vmem>>, %arg5: memref<1x16xf32, #tpu.memory_space<vmem>>, %arg6: memref<8x16xf32, #tpu.memory_space<vmem>>) attributes {dimension_semantics = [#tpu.dimension_semantics<parallel>], iteration_bounds = array<i64: 1>, scalar_prefetch = 0 : i64, scratch_operands = 0 : i64, tpu.core_type = #tpu.core_type<tc>, window_params = [{transform_indices = @transform_0, window_bounds = array<i64: 8, 32>}, {pipeline_mode = #tpu.pipeline_mode<synchronous>, transform_indices = @transform_1, window_bounds = array<i64: 32, 128>}, {pipeline_mode = #tpu.pipeline_mode<synchronous>, transform_indices = @transform_2, window_bounds = array<i64: 1, 128>}, {pipeline_mode = #tpu.pipeline_mode<synchronous>, transform_indices = @transform_3, window_bounds = array<i64: 128, 16>}, {pipeline_mode = #tpu.pipeline_mode<synchronous>, transform_indices = @transform_4, window_bounds = array<i64: 1, 16>}, {transform_indices = @transform_5, window_bounds = array<i64: 8, 16>}]} {
    %c0 = arith.constant 0 : index
    %c0_0 = arith.constant 0 : index
    %0 = vector.load %arg1[%c0, %c0_0] : memref<8x32xf32, #tpu.memory_space<vmem>>, vector<8x32xf32>
    %c0_1 = arith.constant 0 : index
    %c0_2 = arith.constant 0 : index
    %1 = vector.load %arg2[%c0_1, %c0_2] : memref<32x128xf32, #tpu.memory_space<vmem>>, vector<32x128xf32>
    %cst = arith.constant dense<0.000000e+00> : vector<8x128xf32>
    %2 = tpu.matmul %0, %1, %cst {dimension_numbers = #tpu.dot_dimension_numbers<[1], [0], [0], [1], [0, 0, 1, 1], [], []>} : vector<8x32xf32>, vector<32x128xf32>, vector<8x128xf32> -> vector<8x128xf32>
    %c0_3 = arith.constant 0 : index
    %c0_4 = arith.constant 0 : index
    %3 = vector.load %arg3[%c0_3, %c0_4] : memref<1x128xf32, #tpu.memory_space<vmem>>, vector<1x128xf32>
    %4 = vector.broadcast %3 : vector<1x128xf32> to vector<8x128xf32>
    %5 = arith.addf %2, %4 : vector<8x128xf32>
    %cst_5 = arith.constant 0.000000e+00 : f32
    %6 = vector.broadcast %cst_5 : f32 to vector<8x128xf32>
    %7 = arith.maximumf %5, %6 : vector<8x128xf32>
    %c0_6 = arith.constant 0 : index
    %c0_7 = arith.constant 0 : index
    %8 = vector.load %arg4[%c0_6, %c0_7] : memref<128x16xf32, #tpu.memory_space<vmem>>, vector<128x16xf32>
    %cst_8 = arith.constant dense<0.000000e+00> : vector<8x16xf32>
    %9 = tpu.matmul %7, %8, %cst_8 {dimension_numbers = #tpu.dot_dimension_numbers<[1], [0], [0], [1], [0, 0, 1, 1], [], []>} : vector<8x128xf32>, vector<128x16xf32>, vector<8x16xf32> -> vector<8x16xf32>
    %c0_9 = arith.constant 0 : index
    %c0_10 = arith.constant 0 : index
    %10 = vector.load %arg5[%c0_9, %c0_10] : memref<1x16xf32, #tpu.memory_space<vmem>>, vector<1x16xf32>
    %11 = vector.broadcast %10 : vector<1x16xf32> to vector<8x16xf32>
    %12 = arith.addf %9, %11 : vector<8x16xf32>
    %c0_11 = arith.constant 0 : index
    %c0_12 = arith.constant 0 : index
    %13 = vector.load %arg6[%c0_11, %c0_12] : memref<8x16xf32, #tpu.memory_space<vmem>>, vector<8x16xf32>
    tpu.vector_store %arg6[%c0_11, %c0_12], %12 {strides = array<i32>} : memref<8x16xf32, #tpu.memory_space<vmem>>, vector<8x16xf32>,
    return
  }
  func.func @transform_0(%arg0: i32) -> (i32, i32) {
    %c0_i32 = arith.constant 0 : i32
    %c0_i32_0 = arith.constant 0 : i32
    return %arg0, %c0_i32 : i32, i32
  }
  func.func @transform_1(%arg0: i32) -> (i32, i32) {
    %c0_i32 = arith.constant 0 : i32
    %c0_i32_0 = arith.constant 0 : i32
    %c0_i32_1 = arith.constant 0 : i32
    return %c0_i32, %c0_i32_0 : i32, i32
  }
  func.func @transform_2(%arg0: i32) -> (i32, i32) {
    %c0_i32 = arith.constant 0 : i32
    %c0_i32_0 = arith.constant 0 : i32
    %c0_i32_1 = arith.constant 0 : i32
    return %c0_i32, %c0_i32_0 : i32, i32
  }
  func.func @transform_3(%arg0: i32) -> (i32, i32) {
    %c0_i32 = arith.constant 0 : i32
    %c0_i32_0 = arith.constant 0 : i32
    %c0_i32_1 = arith.constant 0 : i32
    return %c0_i32, %c0_i32_0 : i32, i32
  }
  func.func @transform_4(%arg0: i32) -> (i32, i32) {
    %c0_i32 = arith.constant 0 : i32
    %c0_i32_0 = arith.constant 0 : i32
    %c0_i32_1 = arith.constant 0 : i32
    return %c0_i32, %c0_i32_0 : i32, i32
  }
  func.func @transform_5(%arg0: i32) -> (i32, i32) {
    %c0_i32 = arith.constant 0 : i32
    %c0_i32_0 = arith.constant 0 : i32
    return %arg0, %c0_i32 : i32, i32
  }
}

</mosaic_0001>

<bundles_post_ra>
// kernel: tpu_custom_call.1
= control target key start
LH: loop header
LB: loop body
LE: loop exit
PB: predicated region body
PF: predicated region fallthrough
CT: control target
= control target key end

     0   :  { %v346_v3 = vmov 0.0|0.0   ;;  %vm347_vm0 = vmmov 0   ;;  %v348_v6 = vmov 0.0   ;;  %s461_s0 = inlined_call_operand.vmem [shape: f32[8,32], index: 0, kind: input, shape index: {}]   ;;  %s462_s1 = inlined_call_operand.vmem [shape: f32[32,128], index: 1, kind: input, shape index: {}]   ;;  %s463_s2 = inlined_call_operand.vmem [shape: f32[1,128], index: 2, kind: input, shape index: {}]   ;;  %s464_s3 = inlined_call_operand.vmem [shape: f32[128,16], index: 3, kind: input, shape index: {}]   ;;  %s465_s4 = inlined_call_operand.vmem [shape: f32[1,16], index: 4, kind: input, shape index: {}]   ;;  %s466_s5 = inlined_call_operand.hbm [shape: f32[8,16], index: 5, kind: output, shape index: {}]  }
   0x1   :  { %v22_v0 = vld [vmem:[%s462_s1] sm:$0xff]  ;;  %v23_v1 = vld [vmem:[%s462_s1 + $0x8] sm:$0xff]  ;;  %v24_v2 = vld [vmem:[%s462_s1 + $0x10] sm:$0xff]  ;;  %288 = vmatprep.subr.bf16.mxu0 %v346_v3  ;;  %250 = vmatprep.mubr.msk.f32.mxu0 %vm347_vm0, %v348_v6 }
   0x2   :  { %v289_v4 = vpack.c.bf16 %v23_v1, %v22_v0  ;;  %v25_v5 = vld [vmem:[%s462_s1 + $0x18] sm:$0xff]  ;;  %v108_v7 = vld [vmem:[%s464_s3] sm:$0xff]  ;;  %294 = vmatprep.subr.bf16.mxu1 %v346_v3  ;;  %v109_v8 = vld [vmem:[%s464_s3 + $0x8] sm:$0xff]  ;;  %285 = vmatprep.mubr.msk.f32.mxu1 %vm347_vm0, %v348_v6 }
   0x3   :  { %v110_v9 = vld [vmem:[%s464_s3 + $0x10] sm:$0xff]  ;;  %v111_v10 = vld [vmem:[%s464_s3 + $0x18] sm:$0xff]  ;;  %v292_v11 = vpack.c.bf16 %v25_v5, %v24_v2  ;;  %v295_v12 = vpack.c.bf16 %v109_v8, %v108_v7  ;;  %v112_v14 = vld [vmem:[%s464_s3 + $0x20] sm:$0xff] }
   0x4   :  { %290 = vmatpush3.bf16.msra.mxu0 %v289_v4  ;;  %v298_v13 = vpack.c.bf16 %v111_v10, %v110_v9  ;;  %v113_v15 = vld [vmem:[%s464_s3 + $0x28] sm:$0xff] }
   0x5   :  { %291 = vmatprep.subr.bf16.mxu0 %v346_v3  ;;  %296 = vmatpush3.bf16.msra.mxu1 %v295_v12 }
   0x6   :  { %297 = vmatprep.subr.bf16.mxu1 %v346_v3 }
   0x7   :  { %10 = vsyncpa [#allocation3], 0  ;;  %v21_v16 = vld [vmem:[%s461_s0] sm:$0xff]  ;;  %vm33_vm1 = vcmask 261120   ;;  %v301_v17 = vpack.c.bf16 %v113_v15, %v112_v14  ;;  %v114_v18 = vld [vmem:[%s464_s3 + $0x30] sm:$0xff]  ;;  %s349_s11 = smov [#allocation2]  }
   0x8   :  { %293 = vmatpush3.bf16.msra.mxu0 %v292_v11  ;;  %v115_v19 = vld [vmem:[%s464_s3 + $0x38] sm:$0xff]  ;;  %v116_v21 = vld [vmem:[%s464_s3 + $0x40] sm:$0xff]  ;;  %v117_v22 = vld [vmem:[%s464_s3 + $0x48] sm:$0xff]  ;;  %s209_s12 = sshll.u32 %s349_s11, 4  ;;  %vm201_vm2 = vcmask 130048   ;;  %s210_s12 = int_to_ptr.vmem [resolvable:$true] %s209_s12 }
   0x9   :  { %299 = vmatpush3.bf16.msra.mxu1 %v298_v13  ;;  %v304_v20 = vpack.c.bf16 %v115_v19, %v114_v18  ;;  %v307_v23 = vpack.c.bf16 %v117_v22, %v116_v21  ;;  %v118_v24 = vld [vmem:[%s464_s3 + $0x50] sm:$0xff]  ;;  %v119_v25 = vld [vmem:[%s464_s3 + $0x58] sm:$0xff]  ;;  %v120_v27 = vld [vmem:[%s464_s3 + $0x60] sm:$0xff]  ;;  %p327_p1 = scmp.lt.s32.totalorder %s210_s12, %s210_s12 }
   0xa   :  { %300 = vmatprep.subr.bf16.mxu1 %v346_v3  ;;  %v310_v26 = vpack.c.bf16 %v119_v25, %v118_v24  ;;  %v121_v28 = vld [vmem:[%s464_s3 + $0x68] sm:$0xff]  ;;  %v122_v30 = vld [vmem:[%s464_s3 + $0x70] sm:$0xff]  ;;  %v123_v31 = vld [vmem:[%s464_s3 + $0x78] sm:$0xff]  ;;  %s322_s3 = scalar_lea.vmem %s210_s12, 128 }
   0xb   :  { %251 = vmatmul.mubr.msk.f32.vlgmr.msra.gmra.mrb[0].mxu0 %vm33_vm1, %v21_v16  ;;  %v313_v29 = vpack.c.bf16 %v121_v28, %v120_v27  ;;  %v316_v32 = vpack.c.bf16 %v123_v31, %v122_v30  ;;  %v217_v33 = vld [vmem:[%s463_s2] ss:$0 sm:$0xff]  ;;  %p323_p0 = scmp.ne.s32.totalorder %s210_s12, %s322_s3  ;;  %p328_p2 = scmp.lt.s32.totalorder %s322_s3, %s322_s3 }
   0xc   :  { %v219_v38 = vld [vmem:[%s465_s4] ss:$0 sm:$0xff] }
   0xd   :  { %302 = vmatpush3.bf16.msra.mxu1 %v301_v17  ;;  %p329_p3 = por %p328_p2, %p327_p1 }
   0xe   :  { %303 = vmatprep.subr.bf16.mxu1 %v346_v3 }
   0xf   :  { %p330_p4 = pnand %p329_p3, %p323_p0 }
  0x11   :  { %305 = vmatpush3.bf16.msra.mxu1 %v304_v20 }
  0x12   :  { %306 = vmatprep.subr.bf16.mxu1 %v346_v3 }
  0x15   :  { %308 = vmatpush3.bf16.msra.mxu1 %v307_v23 }
  0x16   :  { %309 = vmatprep.subr.bf16.mxu1 %v346_v3 }
  0x19   :  { %311 = vmatpush3.bf16.msra.mxu1 %v310_v26 }
  0x1a   :  { %312 = vmatprep.subr.bf16.mxu1 %v346_v3 }
  0x1d   :  { %314 = vmatpush3.bf16.msra.mxu1 %v313_v29 }
  0x1e   :  { %315 = vmatprep.subr.bf16.mxu1 %v346_v3 }
  0x21   :  { %317 = vmatpush3.bf16.msra.mxu1 %v316_v32 }
  0xde   :  { %v103_v34 = vpop.f32.mrb[0].mxu0 }
  0xdf   :  { %v104_v35 = vadd.f32 %v217_v33, %v103_v34  ;;  %v252_v36 = vpop.f32.mrb[1].mxu0 }
  0xe1   :  { %v107_v37 = vmax.f32 %v104_v35, 0.0 }
  0xe3   :  { %286 = vmatmul.mubr.f32.vlgmr.msra.gmra.mrb[0].mxu1 %v107_v37 }
 0x1b6   :  { %v197_v39 = vpop.f32.mrb[0].mxu1 }
 0x1b7   :  { %v198_v40 = vadd.f32 %v219_v38, %v197_v39  ;;  %v287_v41 = vpop.f32.mrb[1].mxu1 }
 0x1b9   :  { %202 = vst.msk [vmem:[#allocation2] sm:$0xff] %vm201_vm2, %v198_v40 }
 0x1ba   :  { %333 = shalt.err (!%p330_p4)
}
 0x1bb   :  { %s334_s14 = scalar_lea.hbm %s466_s5, 128 }
 0x1bc   :  { %p335_p5 = scmp.ne.s32.totalorder %s466_s5, %s334_s14  ;;  %p338_p6 = scmp.lt.u32.totalorder %s334_s14, %s466_s5 }
 0x1be   :  { %p340_p7 = pnand %p338_p6, %p335_p5 }
 0x1c0   :  { %343 = shalt.err (!%p340_p7)
}
 0x1c1   :  { %212 = dma.vmem_to_hbm [thread:$0]  %s210_s12, 128, %s466_s5, [#allocation3]  }
 0x1c2   :  { %344 = dma.done.wait [#allocation3], 128  }
 0x1c3   :  { %345 = vsyncadd [#allocation3], 4294967168 }
 0x1c4   :  { %216 = vsyncpa [#allocation3], 1 }

</bundles_post_ra>
